<compile_context>
chip_gen: v7x
topology: tpu7x:2x2x1
jax: 0.10.0
libtpu: 0.0.40
codegen_flags: <defaults>
</compile_context>

<pallas_src>
import jax
import jax.numpy as jnp
from jax import lax
from jax.experimental import pallas as pl
from jax.experimental.pallas import tpu as pltpu


def _round_up(x, m):
    return (x + m - 1) // m * m


def asppv2_forward(x_nchw, weights, biases, rates):
    """ASPPv2 forward.

    Args:
      x_nchw:  [N, C_in, H, W] float32 (PyTorch layout).
      weights: [R, C_out, C_in, 3, 3] float32 (PyTorch Conv2d weight per branch).
      biases:  [R, C_out] float32.
      rates:   tuple of python ints (padding == dilation per branch).
    Returns:
      [N, C_out, H, W] float32.
    """
    rates = tuple(int(r) for r in rates)
    R = len(rates)
    N, C_in, H, W = x_nchw.shape
    C_out = weights.shape[1]
    d_max = max(rates)

    # ---- flat-spatial ("shift trick") layout -------------------------------------
    # Channels padded to a multiple of 8 (sublane-aligned tap stores).
    # Columns padded by d_max left and enough right so Wp is a multiple of 8
    # (here Wp=24 -> L_out = H*Wp = 384 = 3*128, lane-dense unmasked output stores).
    # Rows padded by d_max+1 top/bottom: d_max rows of conv zero-padding PLUS one
    # extra row on each side that plays the role of the +/-d_max flat guard, so a
    # SINGLE jnp.pad covers everything.  A 3x3 tap with dilation d is then a pure
    # static 1-D shift of the flattened padded image.
    C_in_p = _round_up(C_in, 8)
    Hp2 = H + 2 * (d_max + 1)
    Wp = _round_up(W + 2 * d_max, 8)
    pad_right = Wp - W - d_max                  # >= d_max by construction
    L_out = H * Wp                              # extended (padded-width) flat output
    L_in = Hp2 * Wp                             # flat padded input (guard included)

    x = x_nchw.astype(jnp.float32)
    x_lin = jnp.pad(
        x, ((0, 0), (0, C_in_p - C_in), (d_max + 1, d_max + 1), (d_max, pad_right))
    ).reshape(N, C_in_p, L_in)

    # Static flat shift for tap (kh, kw) at dilation d, relative to output index 0.
    def tap_shift(kh, kw, d):
        return (d_max + 1 + (kh - 1) * d) * Wp + (kw - 1) * d

    # ---- per-rate weight chunks + tap shift lists (center tap deduplicated) -------
    w_all = jnp.pad(weights.astype(jnp.float32),
                    ((0, 0), (0, 0), (0, C_in_p - C_in), (0, 0), (0, 0)))
    # weight columns for the padded channels are zero -> exact math.
    center_sum = jnp.sum(w_all[:, :, :, 1, 1], axis=0)          # (C_out, C_in_p)

    w_chunks = []        # list of (C_out, n_taps_c * C_in_p) arrays
    chunk_shifts = []    # list of tuples of static flat shifts
    for r_idx, d in enumerate(rates):
        cols, shifts = [], []
        for kh in range(3):
            for kw in range(3):
                if kh == 1 and kw == 1:
                    if r_idx == 0:
                        cols.append(center_sum)                  # merged center tap
                        shifts.append(tap_shift(1, 1, d))        # shift independent of d
                    # other rates: center tap already folded into chunk 0
                else:
                    cols.append(w_all[r_idx, :, :, kh, kw])      # (C_out, C_in_p)
                    shifts.append(tap_shift(kh, kw, d))
        w_chunks.append(jnp.concatenate(cols, axis=1))
        chunk_shifts.append(tuple(shifts))

    n_chunks = len(w_chunks)
    ck_max = max(len(s) for s in chunk_shifts) * C_in_p          # 9*C_in_p
    # Branches are summed after each adds its own bias -> total bias = sum_r b_r.
    b_sum = jnp.sum(biases.astype(jnp.float32), axis=0).reshape(C_out, 1)

    # ---- kernel --------------------------------------------------------------------
    def kernel(*refs):
        x_ref = refs[0]                                   # (1, C_in_p, L_in)
        w_refs = refs[1:1 + n_chunks]                     # each (C_out, ck_c), resident
        b_ref = refs[1 + n_chunks]                        # (C_out, 1), resident
        o_ref = refs[2 + n_chunks]                        # (1, C_out, L_out)
        patch_bufs = refs[3 + n_chunks:3 + n_chunks + 2]  # 2 x (ck_max, L_out) scratch

        acc = None
        for c in range(n_chunks):                         # static unroll over rates
            buf = patch_bufs[c % 2]                       # double buffer: build c+1
            shifts = chunk_shifts[c]                      # overlaps dot of chunk c
            for j, s in enumerate(shifts):                # static unroll over taps
                # Full-sublane (C_in_p=8 rows), full-lane (384=3*128) unmasked store.
                buf[pl.ds(j * C_in_p, C_in_p), :] = x_ref[0, :, pl.ds(s, L_out)]
            ck = len(shifts) * C_in_p
            contrib = jnp.dot(w_refs[c][...], buf[pl.ds(0, ck), :],
                              preferred_element_type=jnp.float32)
            acc = contrib if acc is None else acc + contrib
        # Epilogue kept in f32 (v5e VPU has no bf16); output written exactly once.
        o_ref[0] = (acc + b_ref[...]).astype(o_ref.dtype)

    in_specs = [pl.BlockSpec((1, C_in_p, L_in), lambda n: (n, 0, 0))]
    for wc in w_chunks:
        in_specs.append(pl.BlockSpec(wc.shape, lambda n: (0, 0)))   # constant -> resident
    in_specs.append(pl.BlockSpec((C_out, 1), lambda n: (0, 0)))     # constant -> resident

    out_ext = pl.pallas_call(
        kernel,
        out_shape=jax.ShapeDtypeStruct((N, C_out, L_out), jnp.float32),
        grid_spec=pltpu.PrefetchScalarGridSpec(
            num_scalar_prefetch=0,
            grid=(N,),                                    # batch only; branches fused
            in_specs=in_specs,
            out_specs=pl.BlockSpec((1, C_out, L_out), lambda n: (n, 0, 0)),
            scratch_shapes=[pltpu.VMEM((ck_max, L_out), jnp.float32),
                            pltpu.VMEM((ck_max, L_out), jnp.float32)],
        ),
        compiler_params=pltpu.CompilerParams(
            # TODO(synk): add a parallel H-tile axis so both v7x TensorCores are
            # used when N == 1 (grid=(N,) alone leaves one TC idle for odd/1 N).
            dimension_semantics=("parallel",),
        ),
    )(x_lin, *w_chunks, b_sum)

    # Extended flat output -> NCHW: drop the width-padding columns (cheap XLA ops).
    out = out_ext.reshape(N, C_out, H, Wp)[:, :, :, d_max:d_max + W]
    return out


def asppv2_reference(x_nchw, weights, biases, rates):
    """Pure-JAX reference using lax.conv_general_dilated (NCHW/OIHW)."""
    out = None
    for i, d in enumerate(rates):
        y = lax.conv_general_dilated(
            x_nchw, weights[i],
            window_strides=(1, 1),
            padding=[(d, d), (d, d)],
            rhs_dilation=(d, d),
            dimension_numbers=("NCHW", "OIHW", "NCHW"),
            precision=lax.Precision.HIGHEST,
        ) + biases[i].reshape(1, -1, 1, 1)
        out = y if out is None else out + y
    return out


if __name__ == "__main__":
    # Small shapes consistent with the module: in_channels=4, out_channels=8, rates=(1,2,3).
    N, C_in, H, W = 2, 4, 16, 16
    C_out = 8
    rates = (1, 2, 3)
    R = len(rates)

    key = jax.random.PRNGKey(0)
    kx, kw, kb = jax.random.split(key, 3)
    x = jax.random.normal(kx, (N, C_in, H, W), dtype=jnp.float32)
    # PyTorch Conv2d weight layout [C_out, C_in, 3, 3] per branch, stacked over rates.
    weights = 0.1 * jax.random.normal(kw, (R, C_out, C_in, 3, 3), dtype=jnp.float32)
    biases = 0.1 * jax.random.normal(kb, (R, C_out), dtype=jnp.float32)

    out = asppv2_forward(x, weights, biases, rates)
    out = jax.block_until_ready(out)

    ref = asppv2_reference(x, weights, biases, rates)
    assert out.shape == (N, C_out, H, W)
    assert jnp.allclose(out, ref, atol=2e-3, rtol=2e-3), "mismatch vs reference"

    print("KERNEL_OK")
</pallas_src>

<mosaic_0001>
module attributes {stable_mosaic.version = 11 : i64} {
  func.func @kernel(%arg0: i32, %arg1: memref<1x8x576xf32, #tpu.memory_space<vmem>>, %arg2: memref<8x72xf32, #tpu.memory_space<vmem>>, %arg3: memref<8x64xf32, #tpu.memory_space<vmem>>, %arg4: memref<8x64xf32, #tpu.memory_space<vmem>>, %arg5: memref<8x1xf32, #tpu.memory_space<vmem>>, %arg6: memref<1x8x384xf32, #tpu.memory_space<vmem>>, %arg7: memref<72x384xf32, #tpu.memory_space<vmem>>, %arg8: memref<72x384xf32, #tpu.memory_space<vmem>>) attributes {dimension_semantics = [#tpu.dimension_semantics<parallel>], iteration_bounds = array<i64: 2>, scalar_prefetch = 0 : i64, scratch_operands = 2 : i64, tpu.core_type = #tpu.core_type<tc>, window_params = [{transform_indices = @transform_0, window_bounds = array<i64: 1, 8, 576>}, {pipeline_mode = #tpu.pipeline_mode<synchronous>, transform_indices = @transform_1, window_bounds = array<i64: 8, 72>}, {pipeline_mode = #tpu.pipeline_mode<synchronous>, transform_indices = @transform_2, window_bounds = array<i64: 8, 64>}, {pipeline_mode = #tpu.pipeline_mode<synchronous>, transform_indices = @transform_3, window_bounds = array<i64: 8, 64>}, {pipeline_mode = #tpu.pipeline_mode<synchronous>, transform_indices = @transform_4, window_bounds = array<i64: 8, 1>}, {transform_indices = @transform_5, window_bounds = array<i64: 1, 8, 384>}]} {
    %c0 = arith.constant 0 : index
    %c0_0 = arith.constant 0 : index
    %c71 = arith.constant 71 : index
    %0 = vector.load %arg1[%c0, %c0_0, %c71] : memref<1x8x576xf32, #tpu.memory_space<vmem>>, vector<1x8x384xf32>
    %1 = vector.shape_cast %0 : vector<1x8x384xf32> to vector<8x384xf32>
    %c0_1 = arith.constant 0 : index
    %c0_2 = arith.constant 0 : index
    %2 = vector.load %arg7[%c0_1, %c0_2] : memref<72x384xf32, #tpu.memory_space<vmem>>, vector<8x384xf32>
    tpu.vector_store %arg7[%c0_1, %c0_2], %1 {strides = array<i32>} : memref<72x384xf32, #tpu.memory_space<vmem>>, vector<8x384xf32>,
    %c0_3 = arith.constant 0 : index
    %c0_4 = arith.constant 0 : index
    %c72 = arith.constant 72 : index
    %3 = vector.load %arg1[%c0_3, %c0_4, %c72] : memref<1x8x576xf32, #tpu.memory_space<vmem>>, vector<1x8x384xf32>
    %4 = vector.shape_cast %3 : vector<1x8x384xf32> to vector<8x384xf32>
    %c8 = arith.constant 8 : index
    %c0_5 = arith.constant 0 : index
    %5 = vector.load %arg7[%c8, %c0_5] : memref<72x384xf32, #tpu.memory_space<vmem>>, vector<8x384xf32>
    tpu.vector_store %arg7[%c8, %c0_5], %4 {strides = array<i32>} : memref<72x384xf32, #tpu.memory_space<vmem>>, vector<8x384xf32>,
    %c0_6 = arith.constant 0 : index
    %c0_7 = arith.constant 0 : index
    %c73 = arith.constant 73 : index
    %6 = vector.load %arg1[%c0_6, %c0_7, %c73] : memref<1x8x576xf32, #tpu.memory_space<vmem>>, vector<1x8x384xf32>
    %7 = vector.shape_cast %6 : vector<1x8x384xf32> to vector<8x384xf32>
    %c16 = arith.constant 16 : index
    %c0_8 = arith.constant 0 : index
    %8 = vector.load %arg7[%c16, %c0_8] : memref<72x384xf32, #tpu.memory_space<vmem>>, vector<8x384xf32>
    tpu.vector_store %arg7[%c16, %c0_8], %7 {strides = array<i32>} : memref<72x384xf32, #tpu.memory_space<vmem>>, vector<8x384xf32>,
    %c0_9 = arith.constant 0 : index
    %c0_10 = arith.constant 0 : index
    %c95 = arith.constant 95 : index
    %9 = vector.load %arg1[%c0_9, %c0_10, %c95] : memref<1x8x576xf32, #tpu.memory_space<vmem>>, vector<1x8x384xf32>
    %10 = vector.shape_cast %9 : vector<1x8x384xf32> to vector<8x384xf32>
    %c24 = arith.constant 24 : index
    %c0_11 = arith.constant 0 : index
    %11 = vector.load %arg7[%c24, %c0_11] : memref<72x384xf32, #tpu.memory_space<vmem>>, vector<8x384xf32>
    tpu.vector_store %arg7[%c24, %c0_11], %10 {strides = array<i32>} : memref<72x384xf32, #tpu.memory_space<vmem>>, vector<8x384xf32>,
    %c0_12 = arith.constant 0 : index
    %c0_13 = arith.constant 0 : index
    %c96 = arith.constant 96 : index
    %12 = vector.load %arg1[%c0_12, %c0_13, %c96] : memref<1x8x576xf32, #tpu.memory_space<vmem>>, vector<1x8x384xf32>
    %13 = vector.shape_cast %12 : vector<1x8x384xf32> to vector<8x384xf32>
    %c32 = arith.constant 32 : index
    %c0_14 = arith.constant 0 : index
    %14 = vector.load %arg7[%c32, %c0_14] : memref<72x384xf32, #tpu.memory_space<vmem>>, vector<8x384xf32>
    tpu.vector_store %arg7[%c32, %c0_14], %13 {strides = array<i32>} : memref<72x384xf32, #tpu.memory_space<vmem>>, vector<8x384xf32>,
    %c0_15 = arith.constant 0 : index
    %c0_16 = arith.constant 0 : index
    %c97 = arith.constant 97 : index
    %15 = vector.load %arg1[%c0_15, %c0_16, %c97] : memref<1x8x576xf32, #tpu.memory_space<vmem>>, vector<1x8x384xf32>
    %16 = vector.shape_cast %15 : vector<1x8x384xf32> to vector<8x384xf32>
    %c40 = arith.constant 40 : index
    %c0_17 = arith.constant 0 : index
    %17 = vector.load %arg7[%c40, %c0_17] : memref<72x384xf32, #tpu.memory_space<vmem>>, vector<8x384xf32>
    tpu.vector_store %arg7[%c40, %c0_17], %16 {strides = array<i32>} : memref<72x384xf32, #tpu.memory_space<vmem>>, vector<8x384xf32>,
    %c0_18 = arith.constant 0 : index
    %c0_19 = arith.constant 0 : index
    %c119 = arith.constant 119 : index
    %18 = vector.load %arg1[%c0_18, %c0_19, %c119] : memref<1x8x576xf32, #tpu.memory_space<vmem>>, vector<1x8x384xf32>
    %19 = vector.shape_cast %18 : vector<1x8x384xf32> to vector<8x384xf32>
    %c48 = arith.constant 48 : index
    %c0_20 = arith.constant 0 : index
    %20 = vector.load %arg7[%c48, %c0_20] : memref<72x384xf32, #tpu.memory_space<vmem>>, vector<8x384xf32>
    tpu.vector_store %arg7[%c48, %c0_20], %19 {strides = array<i32>} : memref<72x384xf32, #tpu.memory_space<vmem>>, vector<8x384xf32>,
    %c0_21 = arith.constant 0 : index
    %c0_22 = arith.constant 0 : index
    %c120 = arith.constant 120 : index
    %21 = vector.load %arg1[%c0_21, %c0_22, %c120] : memref<1x8x576xf32, #tpu.memory_space<vmem>>, vector<1x8x384xf32>
    %22 = vector.shape_cast %21 : vector<1x8x384xf32> to vector<8x384xf32>
    %c56 = arith.constant 56 : index
    %c0_23 = arith.constant 0 : index
    %23 = vector.load %arg7[%c56, %c0_23] : memref<72x384xf32, #tpu.memory_space<vmem>>, vector<8x384xf32>
    tpu.vector_store %arg7[%c56, %c0_23], %22 {strides = array<i32>} : memref<72x384xf32, #tpu.memory_space<vmem>>, vector<8x384xf32>,
    %c0_24 = arith.constant 0 : index
    %c0_25 = arith.constant 0 : index
    %c121 = arith.constant 121 : index
    %24 = vector.load %arg1[%c0_24, %c0_25, %c121] : memref<1x8x576xf32, #tpu.memory_space<vmem>>, vector<1x8x384xf32>
    %25 = vector.shape_cast %24 : vector<1x8x384xf32> to vector<8x384xf32>
    %c64 = arith.constant 64 : index
    %c0_26 = arith.constant 0 : index
    %26 = vector.load %arg7[%c64, %c0_26] : memref<72x384xf32, #tpu.memory_space<vmem>>, vector<8x384xf32>
    tpu.vector_store %arg7[%c64, %c0_26], %25 {strides = array<i32>} : memref<72x384xf32, #tpu.memory_space<vmem>>, vector<8x384xf32>,
    %c0_27 = arith.constant 0 : index
    %c0_28 = arith.constant 0 : index
    %27 = vector.load %arg2[%c0_27, %c0_28] : memref<8x72xf32, #tpu.memory_space<vmem>>, vector<8x72xf32>
    %c0_29 = arith.constant 0 : index
    %c0_30 = arith.constant 0 : index
    %28 = vector.load %arg7[%c0_29, %c0_30] : memref<72x384xf32, #tpu.memory_space<vmem>>, vector<72x384xf32>
    %cst = arith.constant dense<0.000000e+00> : vector<8x384xf32>
    %29 = tpu.matmul %27, %28, %cst {dimension_numbers = #tpu.dot_dimension_numbers<[1], [0], [0], [1], [0, 0, 1, 1], [], []>} : vector<8x72xf32>, vector<72x384xf32>, vector<8x384xf32> -> vector<8x384xf32>
    %c0_31 = arith.constant 0 : index
    %c0_32 = arith.constant 0 : index
    %c46 = arith.constant 46 : index
    %30 = vector.load %arg1[%c0_31, %c0_32, %c46] : memref<1x8x576xf32, #tpu.memory_space<vmem>>, vector<1x8x384xf32>
    %31 = vector.shape_cast %30 : vector<1x8x384xf32> to vector<8x384xf32>
    %c0_33 = arith.constant 0 : index
    %c0_34 = arith.constant 0 : index
    %32 = vector.load %arg8[%c0_33, %c0_34] : memref<72x384xf32, #tpu.memory_space<vmem>>, vector<8x384xf32>
    tpu.vector_store %arg8[%c0_33, %c0_34], %31 {strides = array<i32>} : memref<72x384xf32, #tpu.memory_space<vmem>>, vector<8x384xf32>,
    %c0_35 = arith.constant 0 : index
    %c0_36 = arith.constant 0 : index
    %c48_37 = arith.constant 48 : index
    %33 = vector.load %arg1[%c0_35, %c0_36, %c48_37] : memref<1x8x576xf32, #tpu.memory_space<vmem>>, vector<1x8x384xf32>
    %34 = vector.shape_cast %33 : vector<1x8x384xf32> to vector<8x384xf32>
    %c8_38 = arith.constant 8 : index
    %c0_39 = arith.constant 0 : index
    %35 = vector.load %arg8[%c8_38, %c0_39] : memref<72x384xf32, #tpu.memory_space<vmem>>, vector<8x384xf32>
    tpu.vector_store %arg8[%c8_38, %c0_39], %34 {strides = array<i32>} : memref<72x384xf32, #tpu.memory_space<vmem>>, vector<8x384xf32>,
    %c0_40 = arith.constant 0 : index
    %c0_41 = arith.constant 0 : index
    %c50 = arith.constant 50 : index
    %36 = vector.load %arg1[%c0_40, %c0_41, %c50] : memref<1x8x576xf32, #tpu.memory_space<vmem>>, vector<1x8x384xf32>
    %37 = vector.shape_cast %36 : vector<1x8x384xf32> to vector<8x384xf32>
    %c16_42 = arith.constant 16 : index
    %c0_43 = arith.constant 0 : index
    %38 = vector.load %arg8[%c16_42, %c0_43] : memref<72x384xf32, #tpu.memory_space<vmem>>, vector<8x384xf32>
    tpu.vector_store %arg8[%c16_42, %c0_43], %37 {strides = array<i32>} : memref<72x384xf32, #tpu.memory_space<vmem>>, vector<8x384xf32>,
    %c0_44 = arith.constant 0 : index
    %c0_45 = arith.constant 0 : index
    %c94 = arith.constant 94 : index
    %39 = vector.load %arg1[%c0_44, %c0_45, %c94] : memref<1x8x576xf32, #tpu.memory_space<vmem>>, vector<1x8x384xf32>
    %40 = vector.shape_cast %39 : vector<1x8x384xf32> to vector<8x384xf32>
    %c24_46 = arith.constant 24 : index
    %c0_47 = arith.constant 0 : index
    %41 = vector.load %arg8[%c24_46, %c0_47] : memref<72x384xf32, #tpu.memory_space<vmem>>, vector<8x384xf32>
    tpu.vector_store %arg8[%c24_46, %c0_47], %40 {strides = array<i32>} : memref<72x384xf32, #tpu.memory_space<vmem>>, vector<8x384xf32>,
    %c0_48 = arith.constant 0 : index
    %c0_49 = arith.constant 0 : index
    %c98 = arith.constant 98 : index
    %42 = vector.load %arg1[%c0_48, %c0_49, %c98] : memref<1x8x576xf32, #tpu.memory_space<vmem>>, vector<1x8x384xf32>
    %43 = vector.shape_cast %42 : vector<1x8x384xf32> to vector<8x384xf32>
    %c32_50 = arith.constant 32 : index
    %c0_51 = arith.constant 0 : index
    %44 = vector.load %arg8[%c32_50, %c0_51] : memref<72x384xf32, #tpu.memory_space<vmem>>, vector<8x384xf32>
    tpu.vector_store %arg8[%c32_50, %c0_51], %43 {strides = array<i32>} : memref<72x384xf32, #tpu.memory_space<vmem>>, vector<8x384xf32>,
    %c0_52 = arith.constant 0 : index
    %c0_53 = arith.constant 0 : index
    %c142 = arith.constant 142 : index
    %45 = vector.load %arg1[%c0_52, %c0_53, %c142] : memref<1x8x576xf32, #tpu.memory_space<vmem>>, vector<1x8x384xf32>
    %46 = vector.shape_cast %45 : vector<1x8x384xf32> to vector<8x384xf32>
    %c40_54 = arith.constant 40 : index
    %c0_55 = arith.constant 0 : index
    %47 = vector.load %arg8[%c40_54, %c0_55] : memref<72x384xf32, #tpu.memory_space<vmem>>, vector<8x384xf32>
    tpu.vector_store %arg8[%c40_54, %c0_55], %46 {strides = array<i32>} : memref<72x384xf32, #tpu.memory_space<vmem>>, vector<8x384xf32>,
    %c0_56 = arith.constant 0 : index
    %c0_57 = arith.constant 0 : index
    %c144 = arith.constant 144 : index
    %48 = vector.load %arg1[%c0_56, %c0_57, %c144] : memref<1x8x576xf32, #tpu.memory_space<vmem>>, vector<1x8x384xf32>
    %49 = vector.shape_cast %48 : vector<1x8x384xf32> to vector<8x384xf32>
    %c48_58 = arith.constant 48 : index
    %c0_59 = arith.constant 0 : index
    %50 = vector.load %arg8[%c48_58, %c0_59] : memref<72x384xf32, #tpu.memory_space<vmem>>, vector<8x384xf32>
    tpu.vector_store %arg8[%c48_58, %c0_59], %49 {strides = array<i32>} : memref<72x384xf32, #tpu.memory_space<vmem>>, vector<8x384xf32>,
    %c0_60 = arith.constant 0 : index
    %c0_61 = arith.constant 0 : index
    %c146 = arith.constant 146 : index
    %51 = vector.load %arg1[%c0_60, %c0_61, %c146] : memref<1x8x576xf32, #tpu.memory_space<vmem>>, vector<1x8x384xf32>
    %52 = vector.shape_cast %51 : vector<1x8x384xf32> to vector<8x384xf32>
    %c56_62 = arith.constant 56 : index
    %c0_63 = arith.constant 0 : index
    %53 = vector.load %arg8[%c56_62, %c0_63] : memref<72x384xf32, #tpu.memory_space<vmem>>, vector<8x384xf32>
    tpu.vector_store %arg8[%c56_62, %c0_63], %52 {strides = array<i32>} : memref<72x384xf32, #tpu.memory_space<vmem>>, vector<8x384xf32>,
    %c0_64 = arith.constant 0 : index
    %c0_65 = arith.constant 0 : index
    %54 = vector.load %arg3[%c0_64, %c0_65] : memref<8x64xf32, #tpu.memory_space<vmem>>, vector<8x64xf32>
    %c0_66 = arith.constant 0 : index
    %c0_67 = arith.constant 0 : index
    %55 = vector.load %arg8[%c0_66, %c0_67] : memref<72x384xf32, #tpu.memory_space<vmem>>, vector<64x384xf32>
    %cst_68 = arith.constant dense<0.000000e+00> : vector<8x384xf32>
    %56 = tpu.matmul %54, %55, %cst_68 {dimension_numbers = #tpu.dot_dimension_numbers<[1], [0], [0], [1], [0, 0, 1, 1], [], []>} : vector<8x64xf32>, vector<64x384xf32>, vector<8x384xf32> -> vector<8x384xf32>
    %57 = arith.addf %29, %56 : vector<8x384xf32>
    %c0_69 = arith.constant 0 : index
    %c0_70 = arith.constant 0 : index
    %c21 = arith.constant 21 : index
    %58 = vector.load %arg1[%c0_69, %c0_70, %c21] : memref<1x8x576xf32, #tpu.memory_space<vmem>>, vector<1x8x384xf32>
    %59 = vector.shape_cast %58 : vector<1x8x384xf32> to vector<8x384xf32>
    %c0_71 = arith.constant 0 : index
    %c0_72 = arith.constant 0 : index
    %60 = vector.load %arg7[%c0_71, %c0_72] : memref<72x384xf32, #tpu.memory_space<vmem>>, vector<8x384xf32>
    tpu.vector_store %arg7[%c0_71, %c0_72], %59 {strides = array<i32>} : memref<72x384xf32, #tpu.memory_space<vmem>>, vector<8x384xf32>,
    %c0_73 = arith.constant 0 : index
    %c0_74 = arith.constant 0 : index
    %c24_75 = arith.constant 24 : index
    %61 = vector.load %arg1[%c0_73, %c0_74, %c24_75] : memref<1x8x576xf32, #tpu.memory_space<vmem>>, vector<1x8x384xf32>
    %62 = vector.shape_cast %61 : vector<1x8x384xf32> to vector<8x384xf32>
    %c8_76 = arith.constant 8 : index
    %c0_77 = arith.constant 0 : index
    %63 = vector.load %arg7[%c8_76, %c0_77] : memref<72x384xf32, #tpu.memory_space<vmem>>, vector<8x384xf32>
    tpu.vector_store %arg7[%c8_76, %c0_77], %62 {strides = array<i32>} : memref<72x384xf32, #tpu.memory_space<vmem>>, vector<8x384xf32>,
    %c0_78 = arith.constant 0 : index
    %c0_79 = arith.constant 0 : index
    %c27 = arith.constant 27 : index
    %64 = vector.load %arg1[%c0_78, %c0_79, %c27] : memref<1x8x576xf32, #tpu.memory_space<vmem>>, vector<1x8x384xf32>
    %65 = vector.shape_cast %64 : vector<1x8x384xf32> to vector<8x384xf32>
    %c16_80 = arith.constant 16 : index
    %c0_81 = arith.constant 0 : index
    %66 = vector.load %arg7[%c16_80, %c0_81] : memref<72x384xf32, #tpu.memory_space<vmem>>, vector<8x384xf32>
    tpu.vector_store %arg7[%c16_80, %c0_81], %65 {strides = array<i32>} : memref<72x384xf32, #tpu.memory_space<vmem>>, vector<8x384xf32>,
    %c0_82 = arith.constant 0 : index
    %c0_83 = arith.constant 0 : index
    %c93 = arith.constant 93 : index
    %67 = vector.load %arg1[%c0_82, %c0_83, %c93] : memref<1x8x576xf32, #tpu.memory_space<vmem>>, vector<1x8x384xf32>
    %68 = vector.shape_cast %67 : vector<1x8x384xf32> to vector<8x384xf32>
    %c24_84 = arith.constant 24 : index
    %c0_85 = arith.constant 0 : index
    %69 = vector.load %arg7[%c24_84, %c0_85] : memref<72x384xf32, #tpu.memory_space<vmem>>, vector<8x384xf32>
    tpu.vector_store %arg7[%c24_84, %c0_85], %68 {strides = array<i32>} : memref<72x384xf32, #tpu.memory_space<vmem>>, vector<8x384xf32>,
    %c0_86 = arith.constant 0 : index
    %c0_87 = arith.constant 0 : index
    %c99 = arith.constant 99 : index
    %70 = vector.load %arg1[%c0_86, %c0_87, %c99] : memref<1x8x576xf32, #tpu.memory_space<vmem>>, vector<1x8x384xf32>
    %71 = vector.shape_cast %70 : vector<1x8x384xf32> to vector<8x384xf32>
    %c32_88 = arith.constant 32 : index
    %c0_89 = arith.constant 0 : index
    %72 = vector.load %arg7[%c32_88, %c0_89] : memref<72x384xf32, #tpu.memory_space<vmem>>, vector<8x384xf32>
    tpu.vector_store %arg7[%c32_88, %c0_89], %71 {strides = array<i32>} : memref<72x384xf32, #tpu.memory_space<vmem>>, vector<8x384xf32>,
    %c0_90 = arith.constant 0 : index
    %c0_91 = arith.constant 0 : index
    %c165 = arith.constant 165 : index
    %73 = vector.load %arg1[%c0_90, %c0_91, %c165] : memref<1x8x576xf32, #tpu.memory_space<vmem>>, vector<1x8x384xf32>
    %74 = vector.shape_cast %73 : vector<1x8x384xf32> to vector<8x384xf32>
    %c40_92 = arith.constant 40 : index
    %c0_93 = arith.constant 0 : index
    %75 = vector.load %arg7[%c40_92, %c0_93] : memref<72x384xf32, #tpu.memory_space<vmem>>, vector<8x384xf32>
    tpu.vector_store %arg7[%c40_92, %c0_93], %74 {strides = array<i32>} : memref<72x384xf32, #tpu.memory_space<vmem>>, vector<8x384xf32>,
    %c0_94 = arith.constant 0 : index
    %c0_95 = arith.constant 0 : index
    %c168 = arith.constant 168 : index
    %76 = vector.load %arg1[%c0_94, %c0_95, %c168] : memref<1x8x576xf32, #tpu.memory_space<vmem>>, vector<1x8x384xf32>
    %77 = vector.shape_cast %76 : vector<1x8x384xf32> to vector<8x384xf32>
    %c48_96 = arith.constant 48 : index
    %c0_97 = arith.constant 0 : index
    %78 = vector.load %arg7[%c48_96, %c0_97] : memref<72x384xf32, #tpu.memory_space<vmem>>, vector<8x384xf32>
    tpu.vector_store %arg7[%c48_96, %c0_97], %77 {strides = array<i32>} : memref<72x384xf32, #tpu.memory_space<vmem>>, vector<8x384xf32>,
    %c0_98 = arith.constant 0 : index
    %c0_99 = arith.constant 0 : index
    %c171 = arith.constant 171 : index
    %79 = vector.load %arg1[%c0_98, %c0_99, %c171] : memref<1x8x576xf32, #tpu.memory_space<vmem>>, vector<1x8x384xf32>
    %80 = vector.shape_cast %79 : vector<1x8x384xf32> to vector<8x384xf32>
    %c56_100 = arith.constant 56 : index
    %c0_101 = arith.constant 0 : index
    %81 = vector.load %arg7[%c56_100, %c0_101] : memref<72x384xf32, #tpu.memory_space<vmem>>, vector<8x384xf32>
    tpu.vector_store %arg7[%c56_100, %c0_101], %80 {strides = array<i32>} : memref<72x384xf32, #tpu.memory_space<vmem>>, vector<8x384xf32>,
    %c0_102 = arith.constant 0 : index
    %c0_103 = arith.constant 0 : index
    %82 = vector.load %arg4[%c0_102, %c0_103] : memref<8x64xf32, #tpu.memory_space<vmem>>, vector<8x64xf32>
    %c0_104 = arith.constant 0 : index
    %c0_105 = arith.constant 0 : index
    %83 = vector.load %arg7[%c0_104, %c0_105] : memref<72x384xf32, #tpu.memory_space<vmem>>, vector<64x384xf32>
    %cst_106 = arith.constant dense<0.000000e+00> : vector<8x384xf32>
    %84 = tpu.matmul %82, %83, %cst_106 {dimension_numbers = #tpu.dot_dimension_numbers<[1], [0], [0], [1], [0, 0, 1, 1], [], []>} : vector<8x64xf32>, vector<64x384xf32>, vector<8x384xf32> -> vector<8x384xf32>
    %85 = arith.addf %57, %84 : vector<8x384xf32>
    %c0_107 = arith.constant 0 : index
    %c0_108 = arith.constant 0 : index
    %86 = vector.load %arg5[%c0_107, %c0_108] : memref<8x1xf32, #tpu.memory_space<vmem>>, vector<8x1xf32>
    %87 = vector.broadcast %86 : vector<8x1xf32> to vector<8x384xf32>
    %88 = arith.addf %85, %87 : vector<8x384xf32>
    %c0_109 = arith.constant 0 : index
    %c0_110 = arith.constant 0 : index
    %c0_111 = arith.constant 0 : index
    %89 = vector.load %arg6[%c0_109, %c0_110, %c0_111] : memref<1x8x384xf32, #tpu.memory_space<vmem>>, vector<1x8x384xf32>
    %90 = vector.shape_cast %89 : vector<1x8x384xf32> to vector<8x384xf32>
    %91 = vector.shape_cast %88 : vector<8x384xf32> to vector<1x8x384xf32>
    tpu.vector_store %arg6[%c0_109, %c0_110, %c0_111], %91 {strides = array<i32>} : memref<1x8x384xf32, #tpu.memory_space<vmem>>, vector<1x8x384xf32>,
    return
  }
  func.func @transform_0(%arg0: i32) -> (i32, i32, i32) {
    %c0_i32 = arith.constant 0 : i32
    %c0_i32_0 = arith.constant 0 : i32
    %c0_i32_1 = arith.constant 0 : i32
    return %arg0, %c0_i32, %c0_i32_0 : i32, i32, i32
  }
  func.func @transform_1(%arg0: i32) -> (i32, i32) {
    %c0_i32 = arith.constant 0 : i32
    %c0_i32_0 = arith.constant 0 : i32
    %c0_i32_1 = arith.constant 0 : i32
    return %c0_i32, %c0_i32_0 : i32, i32
  }
  func.func @transform_2(%arg0: i32) -> (i32, i32) {
    %c0_i32 = arith.constant 0 : i32
    %c0_i32_0 = arith.constant 0 : i32
    %c0_i32_1 = arith.constant 0 : i32
    return %c0_i32, %c0_i32_0 : i32, i32
  }
  func.func @transform_3(%arg0: i32) -> (i32, i32) {
    %c0_i32 = arith.constant 0 : i32
    %c0_i32_0 = arith.constant 0 : i32
    %c0_i32_1 = arith.constant 0 : i32
    return %c0_i32, %c0_i32_0 : i32, i32
  }
  func.func @transform_4(%arg0: i32) -> (i32, i32) {
    %c0_i32 = arith.constant 0 : i32
    %c0_i32_0 = arith.constant 0 : i32
    %c0_i32_1 = arith.constant 0 : i32
    return %c0_i32, %c0_i32_0 : i32, i32
  }
  func.func @transform_5(%arg0: i32) -> (i32, i32, i32) {
    %c0_i32 = arith.constant 0 : i32
    %c0_i32_0 = arith.constant 0 : i32
    %c0_i32_1 = arith.constant 0 : i32
    return %arg0, %c0_i32, %c0_i32_0 : i32, i32, i32
  }
}

</mosaic_0001>

<bundles_post_ra>
// kernel: tpu_custom_call.1
= control target key start
LH: loop header
LB: loop body
LE: loop exit
PB: predicated region body
PF: predicated region fallthrough
CT: control target
= control target key end

     0   :  { %10 = vsyncpa [#allocation5], 0  ;;  %s2558_s0 = inlined_call_operand.hbm [shape: f32[2,8,576], index: 0, kind: input, shape index: {}]   ;;  %s2559_s1 = inlined_call_operand.vmem [shape: f32[8,72], index: 1, kind: input, shape index: {}]   ;;  %s2560_s2 = inlined_call_operand.vmem [shape: f32[8,64], index: 2, kind: input, shape index: {}]   ;;  %s2561_s3 = inlined_call_operand.hbm [shape: f32[8,64], index: 3, kind: input, shape index: {}]   ;;  %s2562_s4 = inlined_call_operand.vmem [shape: f32[8,1], index: 4, kind: input, shape index: {}]   ;;  %s2563_s5 = inlined_call_operand.hbm [shape: f32[2,8,384], index: 5, kind: output, shape index: {}]  }
   0x1   :  { %12 = vsyncpa [#allocation5 + $0x1], 0 }
   0x2   :  { %13 = vsyncpa [#allocation8], 0 }
   0x3   :  { %14 = vsyncpa [#allocation6], 0 }
   0x4   :  { %16 = vsyncpa [#allocation6 + $0x1], 0  ;;  %s2241_s18 = smov 0   ;;  %s2243_s19 = smov 0  }
   0x5   :  { %s2245_s20 = smov 0   ;;  %s2247_s21 = smov 0  }
   0x6 LB: > { %s2262_s22 = sadd.s32 4294967295, %s2177_s21   ;;  %s1526_s23 = sadd.s32 4294967294, %s2177_s21   ;;  %s2177_s21 = sphi %s2247_s21, %s2587_s21   ;;  %s2173_s20 = sphi %s2245_s20, %s2586_s20   ;;  %s2169_s19 = sphi %s2243_s19, %s2585_s19   ;;  %s2165_s18 = sphi %s2241_s18, %s2584_s18  }
   0x7   : > { %p42_p0 = scmp.ne.s32.totalorder %s2169_s19, %s2165_s18  ;;  %p2564_p1 = scmp.eq.s32.totalorder %s2262_s22, 0 }
   0x8   : > { %p156_p3 = scmp.eq.s32.totalorder %s1526_s23, 1  ;;  %p1527_p5 = scmp.ge.s32.totalorder %s2177_s21, 1 }
   0x9   : > { %p2271_p4 = por %p2564_p1, %p42_p0  ;;  %p163_p7 = scmp.lt.s32.totalorder %s2177_s21, 3 }
   0xa   : > { %p2276_p6 = por %p156_p3, %p42_p0  ;;  %s2179_s27 = smov [#allocation7]  }
   0xb   : > { %s2567_s24 = scalar_select %p2271_p4, 1, 0 }
   0xc   : > { %s2568_s25 = scalar_select %p2276_p6, 1, 0 }
   0xd   : > { %p2281_p8 = pnand %p1527_p5, %p163_p7  ;;  %s182_s28 = sshll.u32 %s2179_s27, 4  ;;  %s183_s28 = int_to_ptr.vmem [resolvable:$true] %s182_s28 }
   0xe   : > { %s2289_s29 = sadd.s32 1, %s2177_s21   ;;  %s29_s8 = sadd.s32 1, %s2173_s20 }
   0xf   : > { %s2569_s26 = scalar_select %p2281_p8, 1, 0 }
  0x10   : > { %p1730_p10 = pneg %p2281_p8  ;;  %s26_s6 = ssub.s32 %s2177_s21, %s2289_s29 }
  0x11   : > { %p2299_p12 = scmp.eq.s32.totalorder %s26_s6, 0  ;;  %s2049_s11 = scalar_lea.hbm %s2561_s3, 128 }
  0x12   : > { %p2293_p11 = pnand %p1730_p10, %p2564_p1  ;;  %p2050_p0 = scmp.ne.s32.totalorder %s2561_s3, %s2049_s11 }
  0x13   : > { %s2571_s7 = scalar_select %p2299_p12, 1, 0 }
  0x14   : > { %p2051_p3 = pneg %p2293_p11  ;;  %p2056_p10 = scmp.lt.u32.totalorder %s2049_s11, %s2561_s3 }
  0x16   : > { %p2052_p5 = pnand %p2051_p3, %p2050_p0 }
  0x18   : > { %p2053_p7 = pneg %p2052_p5 }
  0x1a   : > { %p2058_p9 = pnand %p2056_p10, %p2053_p7 }
  0x1c   : > { %2061 = shalt.err (!%p2058_p9)
}
  0x1d   : > { %s2062_s16 = scalar_lea.vmem %s183_s28, 128  ;;  %p2070_p6 = scmp.lt.s32.totalorder %s183_s28, %s183_s28 }
  0x1e   : > { %p2063_p1 = scmp.ne.s32.totalorder %s183_s28, %s2062_s16  ;;  %p2071_p4 = scmp.lt.s32.totalorder %s2062_s16, %s2062_s16 }
  0x20   : > { %p2065_p2 = pnand %p2063_p1, %p2051_p3  ;;  %p2072_p8 = por %p2071_p4, %p2070_p6 }
  0x22   : > { %p2066_p13 = pneg %p2065_p2 }
  0x24   : > { %p2073_p12 = pnand %p2072_p8, %p2066_p13 }
  0x26   : > { %2076 = shalt.err (!%p2073_p12)
}
  0x27   : > { %1733 = dma.hbm_to_vmem [thread:$0]  (!%p2293_p11), %s2561_s3, 128, %s183_s28, [#allocation8]  }
  0x28   : > { %p2572_p1 = scmp.ne.s32.totalorder %s2571_s7, 0  ;;  %p37_p2 = scmp.eq.s32.totalorder %s2177_s21, 0 }
  0x29   : > { %p2573_p4 = scmp.ne.s32.totalorder %s2173_s20, %s2169_s19  ;;  %p2574_p6 = scmp.eq.s32.totalorder %s2262_s22, 1 }
  0x2a   : > { %s2325_s27 = scalar_select %p2572_p1, %s2173_s20, %s29_s8  }
  0x2b   : > { %p2333_p8 = por %p2574_p6, %p2573_p4  ;;  %p1743_p9 = scmp.lt.s32.totalorder %s2177_s21, 2 }
  0x2c   : > { %s196_s6 = sand.u32 1, %s2173_s20   ;;  %p2576_p12 = pmov %p2573_p4 }
  0x2d   : > { %s1717_s9 = smul.u32 40, %s196_s6  ;;  %s197_s14 = scalar_lea.sflag [#allocation5], %s196_s6 }
  0x2e   : > { %p38_p13 = por %p37_p2, %p2576_p12  ;;  %s1718_s10 = smul.u32 640, %s2177_s21 }
  0x2f   : > { %s200_s12 = scalar_lea.vmem [#allocation4], %s1717_s9  ;;  %s2082_s23 = scalar_lea.hbm %s2558_s0, 1280 }
  0x30   : > { %p2343_p0 = pnand %p1743_p9, %p38_p13  ;;  %s2350_s8 = scalar_lea.hbm %s2558_s0, %s1718_s10 }
  0x31   : > { %s208_s13 = sshll.u32 %s200_s12, 4  ;;  %s2077_s15 = scalar_lea.hbm %s2350_s8, 640  ;;  %s2352_s13 = int_to_ptr.vmem [resolvable:$true] %s208_s13 }
  0x32   : > { %p2078_p11 = scmp.ne.s32.totalorder %s2350_s8, %s2077_s15  ;;  %p2079_p3 = pneg %p2343_p0 }
  0x33   : > { %p2083_p10 = scmp.lt.u32.totalorder %s2350_s8, %s2558_s0  ;;  %p2084_p1 = scmp.lt.u32.totalorder %s2082_s23, %s2077_s15 }
  0x34   : > { %p2080_p5 = pnand %p2079_p3, %p2078_p11  ;;  %p2086_p4 = scmp.lt.u32.totalorder %s2077_s15, %s2350_s8 }
  0x35   : > { %p2085_p2 = por %p2084_p1, %p2083_p10 }
  0x36   : > { %p2081_p7 = pneg %p2080_p5 }
  0x37   : > { %p2087_p6 = por %p2086_p4, %p2085_p2 }
  0x39   : > { %p2088_p9 = pnand %p2087_p6, %p2081_p7 }
  0x3b   : > { %2091 = shalt.err (!%p2088_p9)
}
  0x3c   : > { %s2092_s6 = scalar_lea.vmem %s2352_s13, 640  ;;  %s2180_s9 = smov [#allocation4]  }
  0x3d   : > { %p2093_p12 = scmp.ne.s32.totalorder %s2352_s13, %s2092_s6  ;;  %s2097_s7 = sshll.u32 %s2180_s9, 4  ;;  %s2098_s7 = int_to_ptr.vmem [resolvable:$false] %s2097_s7 }
  0x3e   : > { %s2099_s12 = scalar_lea.vmem %s2098_s7, 1280  ;;  %p2100_p5 = scmp.lt.s32.totalorder %s2352_s13, %s2098_s7 }
  0x3f   : > { %p2095_p13 = pnand %p2093_p12, %p2079_p3  ;;  %p2101_p10 = scmp.lt.s32.totalorder %s2099_s12, %s2092_s6 }
  0x41   : > { %p2096_p11 = pneg %p2095_p13  ;;  %p2102_p1 = por %p2101_p10, %p2100_p5 }
  0x43   : > { %p2103_p2 = pnand %p2102_p1, %p2096_p11 }
  0x45   : > { %2106 = shalt.err (!%p2103_p2)
}
  0x46   : > { %1737 = dma.hbm_to_vmem [thread:$0]  (!%p2343_p0), %s2350_s8, 640, %s2352_s13, %s197_s14  }
  0x47   : > { %p2578_p7 = scmp.ne.s32.totalorder %s2569_s26, 0 }
  0x48   : > { %s2382_s15 = sand.u32 (!%p2578_p7), 1, %s2169_s19   ;;  %p2579_p3 = scmp.ne.s32.totalorder (!%p2578_p7), %s2567_s24, 0 }
  0x49   : > { %217 = sbr.rel (%p2578_p7) target bundleno = 540 (0x21c), region = 40  ;;  %s220_s17 = scalar_lea.sflag (!%p2578_p7), [#allocation5], %s2382_s15 }
  0x4a   : > { %s1719_s16 = smul.u32 (!%p2578_p7), 40, %s2382_s15 }
  0x4c   : > { %s223_s23 = scalar_lea.vmem (!%p2578_p7), [#allocation4], %s1719_s16 }
  0x50   : > { %2152 = dma.done.wait (%p2579_p3), %s220_s17, 640  }
  0x51   : > { %2154 = vsyncadd (%p2579_p3), %s220_s17, 4294966656  ;;  %p2580_p4 = scmp.eq.s32.totalorder %s2262_s22, 0 }
  0x53   : > { %2156 = dma.done.wait (%p2580_p4), [#allocation8], 128   ;;  %p2581_p0 = pmov %p2580_p4 }
  0x54   : > { %v2181_v0 = vmov 0.0|0.0   ;;  %v543_v1 = vld [vmem:[%s223_s23 + $0x8] sm:$0xff]  ;;  %v544_v2 = vld [vmem:[%s223_s23 + $0x10] sm:$0xff]  ;;  %v2395_v3 = vld [vmem:[%s223_s23] sm:$0xff]  ;;  %s2182_s26 = smov 80   ;;  %s2183_s24 = smov 82  }
  0x55   : > { %2158 = vsyncadd (%p2581_p0), [#allocation8], 4294967168  ;;  %1645 = vmatprep.subr.bf16.mxu1 %v2181_v0  ;;  %v2397_v4 = vpack.i.bf16 %v544_v2, %v543_v1  ;;  %v545_v5 = vld [vmem:[%s223_s23 + $0x18] sm:$0xff]  ;;  %s2184_s11 = smov 78   ;;  %s2185_s8 = smov 34   ;;  %v649_v7 = vld [vmem:[%s223_s23 + $0x20] sm:$0xff] }
  0x56   : > { %v2402_v6 = vpack.i.bf16 %v2395_v3, %v545_v5  ;;  %s2186_s13 = smov 30   ;;  %v2412_v8 = vpack.i.bf16 %v543_v1, %v649_v7  ;;  %v2414_v9 = vpack.i.bf16 %v545_v5, %v544_v2  ;;  %s2187_s14 = smov 114   ;;  %vm2189_vm0 = vmmov 0   ;;  %v1419_v12 = vld [vmem:[%s2562_s4] sm:$0xff] }
  0x57   : > { %1819 = vrot.lane.b32.xlu1 %v2397_v4, %s2182_s26  ;;  %1809 = vrot.lane.b32.xlu0 %v2397_v4, %s2183_s24  ;;  %s2188_s10 = smov 112   ;;  %v2190_v10 = vmov 0.0   ;;  %s2191_s28 = smov 110   ;;  %v2208_v11 = vmov 0   ;;  %vm532_vm1 = vcmask 670720   ;;  %vm558_vm2 = vcmask 654336  }
  0x58   : > { %1586 = vmatprep.mubr.msk.f32.mxu1 %vm2189_vm0, %v2190_v10  ;;  %817 = vmatprep.mubr.f32.mxu0 %v2190_v10  ;;  %s2192_s6 = smov 57   ;;  %s2193_s9 = smov 56   ;;  %vm584_vm3 = vcmask 637952   ;;  %vm610_vm4 = vcmask 277504   ;;  %vm636_vm5 = vcmask 244736   ;;  %vm662_vm6 = vcmask 932864  }
  0x59   : > { %s2194_s7 = smov 55   ;;  %s2195_s12 = smov 33   ;;  %2048 = vset.pattern.permute.xlu0 %v2208_v11  ;;  %vm688_vm7 = vcmask 916480   ;;  %vm714_vm8 = vcmask 900096   ;;  %vm749_vm9 = vcmask 523264   ;;  %vm270_vm10 = vcmask 465920  }
  0x5a   : > { %s2196_s16 = smov 32   ;;  %s2197_s17 = smov 31   ;;  %vm296_vm11 = vcmask 457728   ;;  %vm322_vm12 = vcmask 449536   ;;  %vm348_vm13 = vcmask 269312   ;;  %vm374_vm14 = vcmask 261120  }
  0x5b   : > { %1824 = vrot.lane.b32.xlu1 %v2402_v6, %s2182_s26  ;;  %1814 = vrot.lane.b32.xlu0 %v2402_v6, %s2183_s24  ;;  %s2198_s23 = smov 9   ;;  %s2199_s26 = smov 8   ;;  %vm400_vm15 = vcmask 252928  }
  0x5c   : > { %s2200_s24 = smov 7  }
  0x5f   : > { %1834 = vrot.lane.b32.xlu1 %v2402_v6, %s2184_s11  ;;  %1829 = vrot.lane.b32.xlu0 %v2397_v4, %s2184_s11  ;;  %s2201_s11 = smov 107  }
  0x63   : > { %1844 = vrot.lane.b32.xlu1 %v2402_v6, %s2185_s8  ;;  %1839 = vrot.lane.b32.xlu0 %v2397_v4, %s2185_s8  ;;  %s2202_s8 = smov 104  }
  0x67   : > { %1854 = vrot.lane.b32.xlu1 %v2402_v6, %s2186_s13  ;;  %1849 = vrot.lane.b32.xlu0 %v2397_v4, %s2186_s13  ;;  %s2203_s13 = smov 101  }
  0x6b   : > { %1864 = vrot.lane.b32.xlu1 %v2412_v8, %s2187_s14  ;;  %1859 = vrot.lane.b32.xlu0 %v2414_v9, %s2187_s14  ;;  %s2204_s14 = smov 35  }
  0x6f   : > { %1874 = vrot.lane.b32.xlu1 %v2412_v8, %s2188_s10  ;;  %1869 = vrot.lane.b32.xlu0 %v2414_v9, %s2188_s10  ;;  %s2205_s10 = smov 29  }
  0x73   : > { %1884 = vrot.lane.b32.xlu1 %v2412_v8, %s2191_s28  ;;  %1879 = vrot.lane.b32.xlu0 %v2414_v9, %s2191_s28  ;;  %s2206_s28 = smov 91  }
  0x77   : > { %1889 = vrot.lane.b32.xlu0 %v2397_v4, %s2192_s6  ;;  %1894 = vrot.lane.b32.xlu1 %v2402_v6, %s2192_s6  ;;  %s2207_s6 = smov 88  }
  0x7b   : > { %1899 = vrot.lane.b32.xlu0 %v2397_v4, %s2193_s9  ;;  %1904 = vrot.lane.b32.xlu1 %v2402_v6, %s2193_s9  ;;  %s2209_s9 = smov 85  }
  0x7f   : > { %1909 = vrot.lane.b32.xlu0 %v2397_v4, %s2194_s7  ;;  %1914 = vrot.lane.b32.xlu1 %v2402_v6, %s2194_s7 }
  0x83   : > { %1919 = vrot.lane.b32.xlu0 %v2397_v4, %s2195_s12  ;;  %1924 = vrot.lane.b32.xlu1 %v2402_v6, %s2195_s12 }
  0x87   : > { %1929 = vrot.lane.b32.xlu0 %v2397_v4, %s2196_s16  ;;  %1934 = vrot.lane.b32.xlu1 %v2402_v6, %s2196_s16 }
  0x8b   : > { %1939 = vrot.lane.b32.xlu0 %v2397_v4, %s2197_s17  ;;  %1944 = vrot.lane.b32.xlu1 %v2402_v6, %s2197_s17 }
  0x8f   : > { %1949 = vrot.lane.b32.xlu0 %v2397_v4, %s2198_s23  ;;  %1954 = vrot.lane.b32.xlu1 %v2402_v6, %s2198_s23 }
  0x93   : > { %1959 = vrot.lane.b32.xlu0 %v2397_v4, %s2199_s26  ;;  %1964 = vrot.lane.b32.xlu1 %v2402_v6, %s2199_s26 }
  0x97   : > { %472 = vrot.lane.b32.xlu0 %v543_v1, %s2200_s24  ;;  %474 = vrot.lane.b32.xlu1 %v544_v2, %s2200_s24 }
  0x9b   : > { %476 = vrot.lane.b32.xlu0 %v545_v5, %s2200_s24  ;;  %1969 = vrot.lane.b32.xlu1 %v2397_v4, %s2201_s11 }
  0x9f   : > { %1974 = vrot.lane.b32.xlu0 %v2402_v6, %s2201_s11  ;;  %1979 = vrot.lane.b32.xlu1 %v2397_v4, %s2202_s8  ;;  %s1721_s11 = smul.u32 384, %s2262_s22  ;;  %s1432_s22 = scalar_lea.sflag [#allocation6], %s2382_s15 }
  0xa3   : > { %1984 = vrot.lane.b32.xlu0 %v2402_v6, %s2202_s8  ;;  %470 = vrot.lane.b32.xlu1 %v2395_v3, %s2200_s24  ;;  %s1720_s24 = smul.u32 24, %s2382_s15 }
  0xa5   : > { %s253_s8 = scalar_lea.vmem [#allocation9], %s1720_s24 }
  0xa7   : > { %1989 = vrot.lane.b32.xlu0 %v2397_v4, %s2203_s13  ;;  %1994 = vrot.lane.b32.xlu1 %v2402_v6, %s2203_s13  ;;  %s1446_s13 = sshll.u32 %s253_s8, 4  ;;  %s2516_s13 = int_to_ptr.vmem [resolvable:$true] %s1446_s13 }
  0xab   : > { %1999 = vrot.lane.b32.xlu0 %v2397_v4, %s2204_s14  ;;  %2004 = vrot.lane.b32.xlu1 %v2402_v6, %s2204_s14 }
  0xaf   : > { %2009 = vrot.lane.b32.xlu0 %v2397_v4, %s2205_s10  ;;  %2014 = vrot.lane.b32.xlu1 %v2402_v6, %s2205_s10 }
  0xb3   : > { %2019 = vrot.lane.b32.xlu0 %v2414_v9, %s2206_s28  ;;  %2024 = vrot.lane.b32.xlu1 %v2412_v8, %s2206_s28  ;;  %s2514_s28 = scalar_lea.hbm %s2563_s5, %s1721_s11 }
  0xb7   : > { %2029 = vrot.lane.b32.xlu0 %v2414_v9, %s2207_s6  ;;  %2034 = vrot.lane.b32.xlu1 %v2412_v8, %s2207_s6  ;;  %s2107_s6 = scalar_lea.vmem %s2516_s13, 384 }
  0xb8   : > { %p2108_p6 = scmp.ne.s32.totalorder %s2516_s13, %s2107_s6 }
  0xba   : > { %p2109_p9 = pnand %p2108_p6, %p2333_p8 }
  0xbb   : > { %2039 = vrot.lane.b32.xlu0 %v2414_v9, %s2209_s9  ;;  %2044 = vrot.lane.b32.xlu1 %v2412_v8, %s2209_s9  ;;  %s2210_s9 = smov [#allocation9]  }
  0xbc   : > { %p2110_p12 = pneg %p2109_p9  ;;  %s2111_s7 = sshll.u32 %s2210_s9, 4  ;;  %s2112_s7 = int_to_ptr.vmem [resolvable:$false] %s2111_s7 }
  0xbd   : > { %s2113_s12 = scalar_lea.vmem %s2112_s7, 768  ;;  %p2114_p13 = scmp.lt.s32.totalorder %s2516_s13, %s2112_s7 }
  0xbe   : > { %p2115_p11 = scmp.lt.s32.totalorder %s2113_s12, %s2107_s6 }
  0xbf   : > { %1422 = vperm.xlu0 %2048, %v1419_v12  }
  0xc0   : > { %p2116_p5 = por %p2115_p11, %p2114_p13 }
  0xc2   : > { %p2117_p10 = pnand %p2116_p5, %p2110_p12 }
  0xc9   : > { %v1820_v13 = vpop.permute.xlu1 %1819  ;;  %v1810_v14 = vpop.permute.xlu0 %1809 }
  0xca   : > { %v1822_v15 = vunpack.i.h.bf16 %v1820_v13  ;;  %v1821_v16 = vunpack.i.l.bf16 %v1820_v13  ;;  %v1812_v17 = vunpack.i.h.bf16 %v1810_v14  ;;  %v1811_v18 = vunpack.i.l.bf16 %v1810_v14 }
  0xcc   : > { %v534_v19 = vsel %vm532_vm1, %v1811_v18, %v1812_v17  ;;  %v560_v20 = vsel %vm558_vm2, %v1821_v16, %v1822_v15 }
  0xcd   : > { %v1825_v21 = vpop.permute.xlu1 %1824  ;;  %v1815_v22 = vpop.permute.xlu0 %1814  ;;  %v1629_v23 = vpack.c.bf16 %v560_v20, %v534_v19 }
  0xce   : > { %v1827_v24 = vunpack.i.h.bf16 %v1825_v21  ;;  %v1826_v25 = vunpack.i.l.bf16 %v1825_v21  ;;  %v1817_v26 = vunpack.i.h.bf16 %v1815_v22  ;;  %v1816_v27 = vunpack.i.l.bf16 %v1815_v22 }
  0xcf   : > { %1630 = vmatprep.subr.bf16.mxu0 %v1629_v23 }
  0xd0   : > { %v533_v28 = vsel %vm532_vm1, %v1817_v26, %v1811_v18  ;;  %v559_v29 = vsel %vm558_vm2, %v1827_v24, %v1821_v16  ;;  %v535_v30 = vsel %vm532_vm1, %v1812_v17, %v1816_v27  ;;  %v561_v31 = vsel %vm558_vm2, %v1822_v15, %v1826_v25 }
  0xd1   : > { %v1835_v32 = vpop.permute.xlu1 %1834  ;;  %v1830_v33 = vpop.permute.xlu0 %1829  ;;  %v1631_v34 = vpack.c.bf16 %v559_v29, %v533_v28  ;;  %v1646_v35 = vpack.c.bf16 %v561_v31, %v535_v30  ;;  %vm426_vm1 = vcmask 72704   ;;  %vm452_vm2 = vcmask 64512  }
  0xd2   : > { %v1836_v36 = vunpack.i.l.bf16 %v1835_v32  ;;  %v1832_v37 = vunpack.i.h.bf16 %v1830_v33  ;;  %v1831_v38 = vunpack.i.l.bf16 %v1830_v33  ;;  %v1837_v39 = vunpack.i.h.bf16 %v1835_v32 }
  0xd3   : > { %1632 = vmatpush1.bf16.msra.mxu0 %v1631_v34  ;;  %1647 = vmatpush3.bf16.msra.mxu1 %v1646_v35 }
  0xd4   : > { %1648 = vmatprep.subr.bf16.mxu1 %v2181_v0  ;;  %v586_v46 = vsel %vm584_vm3, %v1831_v38, %v1832_v37  ;;  %v587_v47 = vsel %vm584_vm3, %v1832_v37, %v1836_v36  ;;  %v585_v50 = vsel %vm584_vm3, %v1837_v39, %v1831_v38  ;;  %vm478_vm3 = vcmask 56320  }
  0xd5   : > { %v1845_v40 = vpop.permute.xlu1 %1844  ;;  %v1840_v41 = vpop.permute.xlu0 %1839 }
  0xd6   : > { %v1847_v42 = vunpack.i.h.bf16 %v1845_v40  ;;  %v1846_v43 = vunpack.i.l.bf16 %v1845_v40  ;;  %v1842_v44 = vunpack.i.h.bf16 %v1840_v41  ;;  %v1841_v45 = vunpack.i.l.bf16 %v1840_v41  ;;  %v724_v41 = vld [vmem:[%s2560_s2] sm:$0xff] }
  0xd8   : > { %v612_v48 = vsel %vm610_vm4, %v1841_v45, %v1842_v44  ;;  %v613_v49 = vsel %vm610_vm4, %v1842_v44, %v1846_v43  ;;  %v611_v51 = vsel %vm610_vm4, %v1847_v42, %v1841_v45  ;;  %vm894_vm4 = vcmask 588800  }
  0xd9   : > { %v1855_v52 = vpop.permute.xlu1 %1854  ;;  %v1850_v53 = vpop.permute.xlu0 %1849  ;;  %v1633_v54 = vpack.c.bf16 %v612_v48, %v586_v46  ;;  %v1649_v55 = vpack.c.bf16 %v613_v49, %v587_v47  ;;  %v1635_v56 = vpack.c.bf16 %v611_v51, %v585_v50 }
  0xda   : > { %v1856_v57 = vunpack.i.l.bf16 %v1855_v52  ;;  %v1852_v58 = vunpack.i.h.bf16 %v1850_v53  ;;  %v1851_v59 = vunpack.i.l.bf16 %v1850_v53  ;;  %v1857_v60 = vunpack.i.h.bf16 %v1855_v52 }
  0xdb   : > { %1634 = vmatprep.subr.bf16.mxu0 %v1633_v54  ;;  %1650 = vmatpush3.bf16.msra.mxu1 %v1649_v55 }
  0xdc   : > { %1636 = vmatpush1.bf16.msra.mxu0 %v1635_v56  ;;  %1651 = vmatprep.subr.bf16.mxu1 %v2181_v0  ;;  %v638_v4 = vsel %vm636_vm5, %v1851_v59, %v1852_v58  ;;  %v639_v5 = vsel %vm636_vm5, %v1852_v58, %v1856_v57  ;;  %v637_v8 = vsel %vm636_vm5, %v1857_v60, %v1851_v59  ;;  %vm1055_vm5 = vcmask 875520  }
  0xdd   : > { %v1865_v61 = vpop.permute.xlu1 %1864  ;;  %v1860_v62 = vpop.permute.xlu0 %1859 }
  0xde   : > { %v1867_v63 = vunpack.i.h.bf16 %v1865_v61  ;;  %v1866_v1 = vunpack.i.l.bf16 %v1865_v61  ;;  %v1862_v2 = vunpack.i.h.bf16 %v1860_v62  ;;  %v1861_v3 = vunpack.i.l.bf16 %v1860_v62 }
  0xe0   : > { %v664_v6 = vsel %vm662_vm6, %v1861_v3, %v1862_v2  ;;  %v665_v7 = vsel %vm662_vm6, %v1862_v2, %v1866_v1  ;;  %v663_v9 = vsel %vm662_vm6, %v1867_v63, %v1861_v3  ;;  %vm1081_vm6 = vcmask 850944  }
  0xe1   : > { %v1875_v11 = vpop.permute.xlu1 %1874  ;;  %v1870_v12 = vpop.permute.xlu0 %1869  ;;  %v1637_v13 = vpack.c.bf16 %v664_v6, %v638_v4  ;;  %v1652_v14 = vpack.c.bf16 %v665_v7, %v639_v5  ;;  %v1639_v15 = vpack.c.bf16 %v663_v9, %v637_v8 }
  0xe2   : > { %v1876_v16 = vunpack.i.l.bf16 %v1875_v11  ;;  %v1872_v17 = vunpack.i.h.bf16 %v1870_v12  ;;  %v1871_v18 = vunpack.i.l.bf16 %v1870_v12  ;;  %v1877_v19 = vunpack.i.h.bf16 %v1875_v11 }
  0xe3   : > { %1638 = vmatprep.subr.bf16.mxu0 %v1637_v13  ;;  %1653 = vmatpush3.bf16.msra.mxu1 %v1652_v14 }
  0xe4   : > { %1640 = vmatpush1.bf16.msra.mxu0 %v1639_v15  ;;  %1654 = vmatprep.subr.bf16.mxu1 %v2181_v0  ;;  %v690_v26 = vsel %vm688_vm7, %v1871_v18, %v1872_v17  ;;  %v691_v27 = vsel %vm688_vm7, %v1872_v17, %v1876_v16  ;;  %v689_v30 = vsel %vm688_vm7, %v1877_v19, %v1871_v18  ;;  %vm1133_vm7 = vcmask 285696  }
  0xe5   : > { %v1885_v20 = vpop.permute.xlu1 %1884  ;;  %v1880_v21 = vpop.permute.xlu0 %1879 }
  0xe6   : > { %v1887_v22 = vunpack.i.h.bf16 %v1885_v20  ;;  %v1886_v23 = vunpack.i.l.bf16 %v1885_v20  ;;  %v1882_v24 = vunpack.i.h.bf16 %v1880_v21  ;;  %v1881_v25 = vunpack.i.l.bf16 %v1880_v21 }
  0xe8   : > { %v716_v28 = vsel %vm714_vm8, %v1881_v25, %v1882_v24  ;;  %v717_v29 = vsel %vm714_vm8, %v1882_v24, %v1886_v23  ;;  %v715_v31 = vsel %vm714_vm8, %v1887_v22, %v1881_v25  ;;  %vm1159_vm8 = vcmask 236544  }
  0xe9   : > { %v1890_v32 = vpop.permute.xlu0 %1889  ;;  %v1895_v33 = vpop.permute.xlu1 %1894  ;;  %v1641_v34 = vpack.c.bf16 %v716_v28, %v690_v26  ;;  %v1655_v35 = vpack.c.bf16 %v717_v29, %v691_v27  ;;  %v1643_v36 = vpack.c.bf16 %v715_v31, %v689_v30 }
  0xea   : > { %v1892_v37 = vunpack.i.h.bf16 %v1890_v32  ;;  %v1891_v38 = vunpack.i.l.bf16 %v1890_v32  ;;  %v1897_v39 = vunpack.i.h.bf16 %v1895_v33  ;;  %v1896_v40 = vunpack.i.l.bf16 %v1895_v33 }
  0xeb   : > { %1642 = vmatprep.subr.bf16.mxu0 %v1641_v34  ;;  %1656 = vmatpush3.bf16.msra.mxu1 %v1655_v35 }
  0xec   : > { %1644 = vmatpush1.bf16.msra.mxu0 %v1643_v36  ;;  %1673 = vmatprep.subr.bf16.mxu1 %v2181_v0  ;;  %v271_v48 = vsel %vm270_vm10, %v1897_v39, %v1891_v38  ;;  %v273_v49 = vsel %vm270_vm10, %v1892_v37, %v1896_v40  ;;  %v272_v52 = vsel %vm270_vm10, %v1891_v38, %v1892_v37  ;;  %vm1185_vm10 = vcmask 744448  }
  0xed   : > { %v1900_v42 = vpop.permute.xlu0 %1899  ;;  %v1905_v43 = vpop.permute.xlu1 %1904 }
  0xee   : > { %v1902_v44 = vunpack.i.h.bf16 %v1900_v42  ;;  %v1901_v45 = vunpack.i.l.bf16 %v1900_v42  ;;  %v1907_v46 = vunpack.i.h.bf16 %v1905_v43  ;;  %v1906_v47 = vunpack.i.l.bf16 %v1905_v43  ;;  %1587 = vmatmul.mubr.msk.f32.vlgmr.msra.gmra.mrb[0].mxu1 %vm749_vm9, %v724_v41 }
  0xef   : > { %1533 = vmatmul.mubr.msk.f32.vlgmr.msra.gmra.mrb[0].mxu0 %vm749_vm9, %v724_v41  ;;  %1607 = vmatprep.mubr.msk.f32.mxu1 %vm2189_vm0, %v2190_v10 }
  0xf0   : > { %v297_v50 = vsel %vm296_vm11, %v1907_v46, %v1901_v45  ;;  %v299_v51 = vsel %vm296_vm11, %v1902_v44, %v1906_v47  ;;  %v298_v53 = vsel %vm296_vm11, %v1901_v45, %v1902_v44  ;;  %962 = vmatprep.mubr.f32.mxu0 %v2190_v10  ;;  %vm1211_vm11 = vcmask 719872  }
  0xf1   : > { %v1659_v54 = vpack.c.bf16 %v297_v50, %v271_v48  ;;  %v1674_v55 = vpack.c.bf16 %v299_v51, %v273_v49  ;;  %v1910_v56 = vpop.permute.xlu0 %1909  ;;  %v1915_v57 = vpop.permute.xlu1 %1914  ;;  %v1657_v58 = vpack.c.bf16 %v298_v53, %v272_v52 }
  0xf2   : > { %v1912_v59 = vunpack.i.h.bf16 %v1910_v56  ;;  %v1911_v60 = vunpack.i.l.bf16 %v1910_v56  ;;  %v1917_v61 = vunpack.i.h.bf16 %v1915_v57  ;;  %v1916_v62 = vunpack.i.l.bf16 %v1915_v57 }
  0xf3   : > { %1658 = vmatprep.subr.bf16.mxu0 %v1657_v58  ;;  %1675 = vmatpush3.bf16.msra.mxu1 %v1674_v55 }
  0xf4   : > { %1660 = vmatpush1.bf16.msra.mxu0 %v1659_v54  ;;  %1676 = vmatprep.subr.bf16.mxu1 %v2181_v0  ;;  %v323_v6 = vsel %vm322_vm12, %v1917_v61, %v1911_v60  ;;  %v325_v7 = vsel %vm322_vm12, %v1912_v59, %v1916_v62  ;;  %v324_v11 = vsel %vm322_vm12, %v1911_v60, %v1912_v59  ;;  %vm1237_vm12 = vcmask 695296  }
  0xf5   : > { %v1920_v63 = vpop.permute.xlu0 %1919  ;;  %v1925_v1 = vpop.permute.xlu1 %1924 }
  0xf6   : > { %v1922_v2 = vunpack.i.h.bf16 %v1920_v63  ;;  %v1921_v3 = vunpack.i.l.bf16 %v1920_v63  ;;  %v1927_v4 = vunpack.i.h.bf16 %v1925_v1  ;;  %v1926_v5 = vunpack.i.l.bf16 %v1925_v1  ;;  %v488_v63 = vld [vmem:[%s2559_s1] sm:$0xff] }
  0xf8   : > { %v349_v8 = vsel %vm348_vm13, %v1927_v4, %v1921_v3  ;;  %v351_v9 = vsel %vm348_vm13, %v1922_v2, %v1926_v5  ;;  %v350_v12 = vsel %vm348_vm13, %v1921_v3, %v1922_v2 }
  0xf9   : > { %v1663_v13 = vpack.c.bf16 %v349_v8, %v323_v6  ;;  %v1677_v14 = vpack.c.bf16 %v351_v9, %v325_v7  ;;  %v1930_v15 = vpop.permute.xlu0 %1929  ;;  %v1935_v16 = vpop.permute.xlu1 %1934  ;;  %v1661_v17 = vpack.c.bf16 %v350_v12, %v324_v11 }
  0xfa   : > { %v1932_v18 = vunpack.i.h.bf16 %v1930_v15  ;;  %v1931_v19 = vunpack.i.l.bf16 %v1930_v15  ;;  %v1937_v20 = vunpack.i.h.bf16 %v1935_v16  ;;  %v1936_v21 = vunpack.i.l.bf16 %v1935_v16 }
  0xfb   : > { %1662 = vmatprep.subr.bf16.mxu0 %v1661_v17  ;;  %1678 = vmatpush3.bf16.msra.mxu1 %v1677_v14 }
  0xfc   : > { %1664 = vmatpush1.bf16.msra.mxu0 %v1663_v13  ;;  %1679 = vmatprep.subr.bf16.mxu1 %v2181_v0  ;;  %v375_v28 = vsel %vm374_vm14, %v1937_v20, %v1931_v19  ;;  %v377_v29 = vsel %vm374_vm14, %v1932_v18, %v1936_v21  ;;  %v376_v32 = vsel %vm374_vm14, %v1931_v19, %v1932_v18 }
  0xfd   : > { %v1940_v22 = vpop.permute.xlu0 %1939  ;;  %v1945_v23 = vpop.permute.xlu1 %1944 }
  0xfe   : > { %v1942_v24 = vunpack.i.h.bf16 %v1940_v22  ;;  %v1941_v25 = vunpack.i.l.bf16 %v1940_v22  ;;  %v1947_v26 = vunpack.i.h.bf16 %v1945_v23  ;;  %v1946_v27 = vunpack.i.l.bf16 %v1945_v23 }
 0x100   : > { %v401_v30 = vsel %vm400_vm15, %v1947_v26, %v1941_v25  ;;  %v403_v31 = vsel %vm400_vm15, %v1942_v24, %v1946_v27  ;;  %v402_v33 = vsel %vm400_vm15, %v1941_v25, %v1942_v24 }
 0x101   : > { %v1667_v34 = vpack.c.bf16 %v401_v30, %v375_v28  ;;  %v1680_v35 = vpack.c.bf16 %v403_v31, %v377_v29  ;;  %v1950_v36 = vpop.permute.xlu0 %1949  ;;  %v1955_v37 = vpop.permute.xlu1 %1954  ;;  %v1665_v38 = vpack.c.bf16 %v402_v33, %v376_v32 }
 0x102   : > { %v1952_v39 = vunpack.i.h.bf16 %v1950_v36  ;;  %v1951_v40 = vunpack.i.l.bf16 %v1950_v36  ;;  %v1957_v41 = vunpack.i.h.bf16 %v1955_v37  ;;  %v1956_v42 = vunpack.i.l.bf16 %v1955_v37 }
 0x103   : > { %1666 = vmatprep.subr.bf16.mxu0 %v1665_v38  ;;  %1681 = vmatpush3.bf16.msra.mxu1 %v1680_v35 }
 0x104   : > { %1668 = vmatpush1.bf16.msra.mxu0 %v1667_v34  ;;  %1682 = vmatprep.subr.bf16.mxu1 %v2181_v0  ;;  %v427_v49 = vsel %vm426_vm1, %v1957_v41, %v1951_v40  ;;  %v429_v50 = vsel %vm426_vm1, %v1952_v39, %v1956_v42  ;;  %v428_v53 = vsel %vm426_vm1, %v1951_v40, %v1952_v39 }
 0x105   : > { %v1960_v43 = vpop.permute.xlu0 %1959  ;;  %v1965_v44 = vpop.permute.xlu1 %1964 }
 0x106   : > { %v1962_v45 = vunpack.i.h.bf16 %v1960_v43  ;;  %v1961_v46 = vunpack.i.l.bf16 %v1960_v43  ;;  %v1967_v47 = vunpack.i.h.bf16 %v1965_v44  ;;  %v1966_v48 = vunpack.i.l.bf16 %v1965_v44 }
 0x108   : > { %v453_v51 = vsel %vm452_vm2, %v1967_v47, %v1961_v46  ;;  %v455_v52 = vsel %vm452_vm2, %v1962_v45, %v1966_v48  ;;  %v454_v54 = vsel %vm452_vm2, %v1961_v46, %v1962_v45 }
 0x109   : > { %v1671_v55 = vpack.c.bf16 %v453_v51, %v427_v49  ;;  %v1683_v56 = vpack.c.bf16 %v455_v52, %v429_v50  ;;  %v473_v57 = vpop.permute.xlu0 %472  ;;  %v475_v58 = vpop.permute.xlu1 %474  ;;  %v1669_v59 = vpack.c.bf16 %v454_v54, %v428_v53 }
 0x10a   : > { %v480_v60 = vsel %vm478_vm3, %v473_v57, %v475_v58 }
 0x10b   : > { %1670 = vmatprep.subr.bf16.mxu0 %v1669_v59  ;;  %1684 = vmatpush3.bf16.msra.mxu1 %v1683_v56 }
 0x10c   : > { %1672 = vmatpush1.bf16.msra.mxu0 %v1671_v55  ;;  %1605 = vmatprep.subr.mxu1 %v2190_v10 }
 0x10d   : > { %v477_v61 = vpop.permute.xlu0 %476  ;;  %v1970_v62 = vpop.permute.xlu1 %1969  ;;  %914 = vmatprep.subr.mxu0 %v480_v60 }
 0x10e   : > { %v481_v1 = vsel %vm478_vm3, %v475_v58, %v477_v61  ;;  %v1972_v2 = vunpack.i.h.bf16 %v1970_v62  ;;  %v1971_v3 = vunpack.i.l.bf16 %v1970_v62 }
 0x10f   : > { %1606 = vmatpush3.msra.mxu1 %v481_v1 }
 0x110   : > { %1608 = vmatmul.mubr.msk.f32.vlgmr.msra.gmra.mrb[2].mxu1 %vm894_vm4, %v488_v63  ;;  %1701 = vmatprep.subr.bf16.mxu1 %v2181_v0  ;;  %v1057_v11 = vsel %vm1055_vm5, %v1971_v3, %v1972_v2 }
 0x111   : > { %v1975_v4 = vpop.permute.xlu0 %1974  ;;  %v1980_v5 = vpop.permute.xlu1 %1979  ;;  %1626 = vmatprep.mubr.msk.f32.mxu1 %vm2189_vm0, %v2190_v10  ;;  %vm1107_vm0 = vcmask 826368  }
 0x112   : > { %v1982_v6 = vunpack.i.h.bf16 %v1980_v5  ;;  %v1981_v7 = vunpack.i.l.bf16 %v1980_v5  ;;  %v1977_v8 = vunpack.i.h.bf16 %v1975_v4  ;;  %v1976_v9 = vunpack.i.l.bf16 %v1975_v4 }
 0x114   : > { %v1083_v12 = vsel %vm1081_vm6, %v1981_v7, %v1982_v6  ;;  %v1056_v19 = vsel %vm1055_vm5, %v1977_v8, %v1971_v3  ;;  %v1058_v20 = vsel %vm1055_vm5, %v1972_v2, %v1976_v9 }
 0x115   : > { %v1985_v13 = vpop.permute.xlu0 %1984  ;;  %v471_v14 = vpop.permute.xlu1 %470  ;;  %v1685_v15 = vpack.c.bf16 %v1083_v12, %v1057_v11 }
 0x116   : > { %v1987_v16 = vunpack.i.h.bf16 %v1985_v13  ;;  %v1986_v17 = vunpack.i.l.bf16 %v1985_v13  ;;  %v479_v18 = vsel %vm478_vm3, %v471_v14, %v473_v57 }
 0x117   : > { %915 = vmatpush1.msra.mxu0 %v479_v18 }
 0x118   : > { %v1082_v21 = vsel %vm1081_vm6, %v1987_v16, %v1981_v7  ;;  %v1084_v22 = vsel %vm1081_vm6, %v1982_v6, %v1986_v17  ;;  %1686 = vmatprep.subr.bf16.mxu0 %v1685_v15  ;;  %1535 = vmatmul.mubr.msk.f32.vlgmr.msra.gmra.mrb[0].mxu0 %vm894_vm4, %v488_v63 }
 0x119   : > { %v1687_v23 = vpack.c.bf16 %v1082_v21, %v1056_v19  ;;  %v1702_v24 = vpack.c.bf16 %v1084_v22, %v1058_v20  ;;  %v1990_v25 = vpop.permute.xlu0 %1989  ;;  %v1995_v26 = vpop.permute.xlu1 %1994  ;;  %1339 = vmatprep.mubr.f32.mxu0 %v2190_v10 }
 0x11a   : > { %v1992_v27 = vunpack.i.h.bf16 %v1990_v25  ;;  %v1991_v28 = vunpack.i.l.bf16 %v1990_v25  ;;  %v1997_v29 = vunpack.i.h.bf16 %v1995_v26  ;;  %v1996_v30 = vunpack.i.l.bf16 %v1995_v26 }
 0x11b   : > { %1688 = vmatpush1.bf16.msra.mxu0 %v1687_v23  ;;  %1703 = vmatpush3.bf16.msra.mxu1 %v1702_v24 }
 0x11c   : > { %1704 = vmatprep.subr.bf16.mxu1 %v2181_v0  ;;  %v1108_v37 = vsel %vm1107_vm0, %v1997_v29, %v1991_v28  ;;  %v1110_v38 = vsel %vm1107_vm0, %v1992_v27, %v1996_v30  ;;  %v1109_v40 = vsel %vm1107_vm0, %v1991_v28, %v1992_v27 }
 0x11d   : > { %v2000_v31 = vpop.permute.xlu0 %1999  ;;  %v2005_v32 = vpop.permute.xlu1 %2004 }
 0x11e   : > { %v2002_v33 = vunpack.i.h.bf16 %v2000_v31  ;;  %v2001_v34 = vunpack.i.l.bf16 %v2000_v31  ;;  %v2007_v35 = vunpack.i.h.bf16 %v2005_v32  ;;  %v2006_v36 = vunpack.i.l.bf16 %v2005_v32 }
 0x120   : > { %v1134_v39 = vsel %vm1133_vm7, %v2007_v35, %v2001_v34  ;;  %v1136_v10 = vsel %vm1133_vm7, %v2002_v33, %v2006_v36  ;;  %v1135_v41 = vsel %vm1133_vm7, %v2001_v34, %v2002_v33 }
 0x121   : > { %v1691_v42 = vpack.c.bf16 %v1134_v39, %v1108_v37  ;;  %v1705_v43 = vpack.c.bf16 %v1136_v10, %v1110_v38  ;;  %v2010_v44 = vpop.permute.xlu0 %2009  ;;  %v2015_v45 = vpop.permute.xlu1 %2014  ;;  %v1689_v46 = vpack.c.bf16 %v1135_v41, %v1109_v40 }
 0x122   : > { %v2012_v47 = vunpack.i.h.bf16 %v2010_v44  ;;  %v2011_v48 = vunpack.i.l.bf16 %v2010_v44  ;;  %v2017_v49 = vunpack.i.h.bf16 %v2015_v45  ;;  %v2016_v50 = vunpack.i.l.bf16 %v2015_v45 }
 0x123   : > { %1690 = vmatprep.subr.bf16.mxu0 %v1689_v46  ;;  %1706 = vmatpush3.bf16.msra.mxu1 %v1705_v43 }
 0x124   : > { %1692 = vmatpush1.bf16.msra.mxu0 %v1691_v42  ;;  %1707 = vmatprep.subr.bf16.mxu1 %v2181_v0  ;;  %v1160_v57 = vsel %vm1159_vm8, %v2017_v49, %v2011_v48  ;;  %v1162_v58 = vsel %vm1159_vm8, %v2012_v47, %v2016_v50  ;;  %v1161_v61 = vsel %vm1159_vm8, %v2011_v48, %v2012_v47 }
 0x125   : > { %v2020_v51 = vpop.permute.xlu0 %2019  ;;  %v2025_v52 = vpop.permute.xlu1 %2024 }
 0x126   : > { %v2022_v53 = vunpack.i.h.bf16 %v2020_v51  ;;  %v2021_v54 = vunpack.i.l.bf16 %v2020_v51  ;;  %v2027_v55 = vunpack.i.h.bf16 %v2025_v52  ;;  %v2026_v56 = vunpack.i.l.bf16 %v2025_v52 }
 0x128   : > { %v1186_v59 = vsel %vm1185_vm10, %v2027_v55, %v2021_v54  ;;  %v1188_v60 = vsel %vm1185_vm10, %v2022_v53, %v2026_v56  ;;  %v1187_v62 = vsel %vm1185_vm10, %v2021_v54, %v2022_v53 }
 0x129   : > { %v1695_v63 = vpack.c.bf16 %v1186_v59, %v1160_v57  ;;  %v1708_v1 = vpack.c.bf16 %v1188_v60, %v1162_v58  ;;  %v2030_v2 = vpop.permute.xlu0 %2029  ;;  %v2035_v3 = vpop.permute.xlu1 %2034  ;;  %v1693_v4 = vpack.c.bf16 %v1187_v62, %v1161_v61 }
 0x12a   : > { %v2032_v5 = vunpack.i.h.bf16 %v2030_v2  ;;  %v2031_v6 = vunpack.i.l.bf16 %v2030_v2  ;;  %v2037_v7 = vunpack.i.h.bf16 %v2035_v3  ;;  %v2036_v8 = vunpack.i.l.bf16 %v2035_v3 }
 0x12b   : > { %1694 = vmatprep.subr.bf16.mxu0 %v1693_v4  ;;  %1709 = vmatpush3.bf16.msra.mxu1 %v1708_v1 }
 0x12c   : > { %1696 = vmatpush1.bf16.msra.mxu0 %v1695_v63  ;;  %1710 = vmatprep.subr.bf16.mxu1 %v2181_v0  ;;  %v1212_v16 = vsel %vm1211_vm11, %v2037_v7, %v2031_v6  ;;  %v1214_v17 = vsel %vm1211_vm11, %v2032_v5, %v2036_v8  ;;  %v1213_v20 = vsel %vm1211_vm11, %v2031_v6, %v2032_v5  ;;  %v1247_v0 = vld [vmem:[#allocation7] sm:$0xff] }
 0x12d   : > { %v2040_v9 = vpop.permute.xlu0 %2039  ;;  %v2045_v11 = vpop.permute.xlu1 %2044 }
 0x12e   : > { %v2042_v12 = vunpack.i.h.bf16 %v2040_v9  ;;  %v2041_v13 = vunpack.i.l.bf16 %v2040_v9  ;;  %v2047_v14 = vunpack.i.h.bf16 %v2045_v11  ;;  %v2046_v15 = vunpack.i.l.bf16 %v2045_v11 }
 0x130   : > { %v1238_v18 = vsel %vm1237_vm12, %v2047_v14, %v2041_v13  ;;  %v1240_v19 = vsel %vm1237_vm12, %v2042_v12, %v2046_v15  ;;  %v1239_v21 = vsel %vm1237_vm12, %v2041_v13, %v2042_v12 }
 0x131   : > { %v1699_v22 = vpack.c.bf16 %v1238_v18, %v1212_v16  ;;  %v1711_v23 = vpack.c.bf16 %v1240_v19, %v1214_v17  ;;  %v1697_v24 = vpack.c.bf16 %v1239_v21, %v1213_v20 }
 0x133   : > { %1698 = vmatprep.subr.bf16.mxu0 %v1697_v24  ;;  %1712 = vmatpush3.bf16.msra.mxu1 %v1711_v23 }
 0x134   : > { %1700 = vmatpush1.bf16.msra.mxu0 %v1699_v22 }
 0x136   : > { %1627 = vmatmul.mubr.msk.f32.vlgmr.msra.gmra.mrb[4].mxu1 %vm749_vm9, %v1247_v0 }
 0x137   : > { %1537 = vmatmul.mubr.msk.f32.vlgmr.msra.gmra.mrb[0].mxu0 %vm749_vm9, %v1247_v0 }
 0x13e   : > { %v1423_v30 = vpop.permute.xlu0 %1422 }
 0x1c1   : > { %v890_v25 = vpop.f32.mrb[0].mxu1 }
 0x1c2   : > { %v1588_v26 = vpop.f32.mrb[1].mxu1 }
 0x1e3   : > { %v1035_v27 = vpop.f32.mrb[2].mxu1 }
 0x1e4   : > { %v1036_v28 = vadd.f32 %v1035_v27, %v890_v25  ;;  %v1609_v29 = vpop.f32.mrb[3].mxu1 }
 0x209   : > { %v1412_v31 = vpop.f32.mrb[4].mxu1 }
 0x20a   : > { %v1418_v32 = vadd.f32 %v1412_v31, %v1036_v28  ;;  %v1341_v33 = vpop.f32.mrb[0].mxu0  ;;  %v1628_v34 = vpop.f32.mrb[5].mxu1 }
 0x20b   : > { %v1425_v35 = vadd.f32 %v1423_v30, %v1341_v33  ;;  %v1343_v36 = vpop.f32.mrb[1].mxu0 }
 0x20c   : > { %v1427_v37 = vadd.f32 %v1423_v30, %v1418_v32  ;;  %v1426_v38 = vadd.f32 %v1423_v30, %v1343_v36 }
 0x20d   : > { %1428 = vst [vmem:[%s253_s8] sm:$0xff] %v1425_v35 }
 0x20e   : > { %1430 = vst [vmem:[%s253_s8 + $0x10] sm:$0xff] %v1427_v37  ;;  %1429 = vst [vmem:[%s253_s8 + $0x8] sm:$0xff] %v1426_v38 }
 0x20f   : > { %2120 = shalt.err (!%p2117_p10)
}
 0x210   : > { %s2121_s15 = scalar_lea.hbm %s2514_s28, 384  ;;  %s2125_s23 = scalar_lea.hbm %s2563_s5, 768 }
 0x211   : > { %p2122_p1 = scmp.ne.s32.totalorder %s2514_s28, %s2121_s15  ;;  %p2126_p3 = scmp.lt.u32.totalorder %s2514_s28, %s2563_s5 }
 0x212   : > { %p2127_p4 = scmp.lt.u32.totalorder %s2125_s23, %s2121_s15  ;;  %p2129_p6 = scmp.lt.u32.totalorder %s2121_s15, %s2514_s28 }
 0x213   : > { %p2123_p2 = pnand %p2122_p1, %p2333_p8 }
 0x214   : > { %p2128_p0 = por %p2127_p4, %p2126_p3 }
 0x215   : > { %p2124_p7 = pneg %p2123_p2 }
 0x216   : > { %p2130_p9 = por %p2129_p6, %p2128_p0 }
 0x218   : > { %p2131_p12 = pnand %p2130_p9, %p2124_p7 }
 0x21a   : > { %2134 = shalt.err (!%p2131_p12)
}
 0x21b   : > { %1728 = dma.vmem_to_hbm [thread:$0]  (%p2333_p8), %s2516_s13, 384, %s2514_s28, %s1432_s22  }
 0x21c PF: > { %s1458_s11 = sand.u32 1, %s2165_s18   ;;  %p2582_p13 = scmp.ne.s32.totalorder %s2568_s25, 0 }
 0x21d   : > { %p2583_p11 = scmp.ge.s32.totalorder %s2177_s21, 2  ;;  %s1459_s8 = scalar_lea.sflag [#allocation6], %s1458_s11 }
 0x21f   : > { %p1739_p5 = pnand %p2583_p11, %p2582_p13 }
 0x221   : > { %2160 = dma.done.wait (!%p1739_p5), %s1459_s8, 384  }
 0x222   : > { %2162 = vsyncadd (!%p1739_p5), %s1459_s8, 4294966912  ;;  %p19_p10 = scmp.ge.s32.totalorder %s2289_s29, 4   ;;  %s2584_s18 = smov %s2169_s19 }
 0x223   : > { %s2585_s19 = smov %s2173_s20  ;;  %s2586_s20 = smov %s2325_s27 }
 0x224   : > { %s2587_s21 = smov %s2289_s29  ;;  %21 = sbr.rel (!%p19_p10) target bundleno = 6 (0x6), region = 89 }
 0x22b   :  { %1464 = vsyncpa [#allocation5], 1 }
 0x22c   :  { %1466 = vsyncpa [#allocation5 + $0x1], 1 }
 0x22d   :  { %1467 = vsyncpa [#allocation8], 1 }
 0x22e   :  { %1468 = vsyncpa [#allocation6], 1 }
 0x22f   :  { %1470 = vsyncpa [#allocation6 + $0x1], 1 }

</bundles_post_ra>
